<compile_context>
chip_gen: v6e
topology: v6e:2x2x1
jax: 0.10.0
libtpu: 0.0.40
codegen_flags: <defaults>
</compile_context>

<pallas_src>
import functools
import math

import jax
import jax.numpy as jnp
from jax import lax
from jax.experimental import pallas as pl
from jax.experimental.pallas import tpu as pltpu


def _round_up(x, m):
    return ((x + m - 1) // m) * m


def _pick_tile(size, align, max_tile):
    """Pick a tile size (multiple of `align`) and a padded extent it divides."""
    aligned = _round_up(size, align)
    if aligned <= max_tile:
        return aligned, aligned
    best = align
    for t in range(max_tile, align - 1, -align):
        if aligned % t == 0:
            best = t
            break
    if best * 4 >= max_tile:
        return best, aligned
    # Only tiny divisors exist: accept some padding, keep large tiles.
    return max_tile, _round_up(size, max_tile)


def _focal_elementwise(x, t, a, gamma):
    """Per-element focal loss in f32 (EUP-lean, numerically stable).

      BCE  = max(x,0) - x*t + log(1 + exp(-|x|))
      p    = sigmoid(x)                         (reuses exp(-|x|))
      p_t  = t*p + (1-t)*(1-p)
      loss = alpha * (1 - p_t)**gamma * BCE
    """
    e = jnp.exp(-jnp.abs(x))                   # single exp, reused twice
    # 1+e is in (1, 2], so plain log is perfectly conditioned (no log1p needed).
    bce = jnp.maximum(x, 0.0) - x * t + jnp.log(1.0 + e)
    inv = 1.0 / (1.0 + e)                      # exact reciprocal (EUP + refine)
    probs = jnp.where(x >= 0.0, inv, e * inv)  # sigmoid(x) without a second exp
    p_t = t * probs + (1.0 - t) * (1.0 - probs)
    q = jnp.maximum(1.0 - p_t, 0.0)            # clamp so pow/square is safe
    g = float(gamma)
    if g.is_integer() and 0.0 <= g <= 8.0:
        gi = int(g)
        focal = jnp.ones_like(q) if gi == 0 else q
        for _ in range(max(gi - 1, 0)):
            focal = focal * q                  # VPU multiplies, no EUP pow
    else:
        focal = q ** g                         # generic: exp(g*log(q))
    return a * focal * bce                     # alpha (1,TC) broadcasts


def _focal_none_kernel(gamma, x_ref, t_ref, a_ref, o_ref):
    x = x_ref[...].astype(jnp.float32)
    t = t_ref[...].astype(jnp.float32)
    a = a_ref[...].astype(jnp.float32)
    o_ref[...] = _focal_elementwise(x, t, a, gamma).astype(o_ref.dtype)


def _focal_sum_kernel(gamma, rows, cols, tile_b, tile_c, need_mask,
                      x_ref, t_ref, a_ref, o_ref):
    i = pl.program_id(0)
    j = pl.program_id(1)

    @pl.when((i == 0) & (j == 0))
    def _init():
        o_ref[...] = jnp.zeros_like(o_ref)

    x = x_ref[...].astype(jnp.float32)
    t = t_ref[...].astype(jnp.float32)
    a = a_ref[...].astype(jnp.float32)
    loss = _focal_elementwise(x, t, a, gamma)
    if need_mask:  # zero padded rows/cols so they don't pollute the sum
        r = i * tile_b + lax.broadcasted_iota(jnp.int32, (tile_b, tile_c), 0)
        c = j * tile_c + lax.broadcasted_iota(jnp.int32, (tile_b, tile_c), 1)
        loss = jnp.where((r < rows) & (c < cols), loss, 0.0)
    # Resident (1,1) accumulator output block (same block for every grid step).
    o_ref[...] += jnp.sum(loss, keepdims=True)


def focal_loss(inputs, targets, alpha, gamma=2.0, reduction="mean"):
    """JAX/Pallas equivalent of FocalLoss.forward.

    inputs : (B, C) raw logits (f32, or bf16 to halve HBM traffic)
    targets: (B, C) binary ground truth
    alpha  : scalar or (C,) per-class balancing factors
    """
    if reduction not in ("mean", "sum", "none"):
        raise ValueError(f"unknown reduction {reduction!r}")

    inputs = jnp.asarray(inputs)
    targets = jnp.asarray(targets)
    B, C = inputs.shape
    alpha_arr = jnp.asarray(alpha, jnp.float32)
    if alpha_arr.ndim == 0:
        alpha_arr = jnp.broadcast_to(alpha_arr, (C,))
    alpha_row = alpha_arr.reshape(1, C)

    # ---- layout: make the last dim lane-dense (multiple of 128) ------------
    # If C is tiny (e.g. C=4), fold k batch rows into each kernel row so lanes
    # are dense instead of mostly padding; alpha is simply tiled k times.
    rows, cols, fold = B, C, 1
    if C % 128 != 0:
        k = 128 // math.gcd(C, 128)
        if k > 1 and B % k == 0:
            rows, cols, fold = B // k, k * C, k
    x2 = inputs.reshape(rows, cols)
    t2 = targets.reshape(rows, cols)
    a2 = jnp.tile(alpha_row, (1, fold))

    # ---- tile sizes & padding ----------------------------------------------
    tile_b, Bp = _pick_tile(rows, 8, 512)
    tile_c, Cp = _pick_tile(cols, 128, 1024)
    need_mask = (Bp != rows) or (Cp != cols)
    if need_mask:
        x2 = jnp.pad(x2, ((0, Bp - rows), (0, Cp - cols)))
        t2 = jnp.pad(t2, ((0, Bp - rows), (0, Cp - cols)))
        a2 = jnp.pad(a2, ((0, 0), (0, Cp - cols)))
    grid = (Bp // tile_b, Cp // tile_c)

    in_specs = [
        pl.BlockSpec((tile_b, tile_c), lambda i, j: (i, j)),   # logits
        pl.BlockSpec((tile_b, tile_c), lambda i, j: (i, j)),   # targets
        pl.BlockSpec((1, tile_c), lambda i, j: (0, j)),        # alpha row
    ]

    # Explicit VMEM budget (double-buffered streams + headroom) so the same
    # tiling stays within v7x's 64 MiB as well as v5e/v6e.
    n_streams = 3 if reduction == "none" else 2
    tile_bytes = tile_b * tile_c * 4
    vmem_limit = max(int(tile_bytes * n_streams * 2 * 1.25) + (2 << 20),
                     16 * 1024 * 1024)

    if reduction == "none":
        out = pl.pallas_call(
            functools.partial(_focal_none_kernel, float(gamma)),
            out_shape=jax.ShapeDtypeStruct((Bp, Cp), inputs.dtype),
            grid=grid,
            in_specs=in_specs,
            out_specs=pl.BlockSpec((tile_b, tile_c), lambda i, j: (i, j)),
            compiler_params=pltpu.CompilerParams(
                dimension_semantics=("parallel", "parallel"),
                vmem_limit_bytes=vmem_limit),
        )(x2, t2, a2)
        if need_mask:
            out = out[:rows, :cols]
        return out.reshape(B, C)

    # 'mean' / 'sum': accumulate into a resident (1,1) output block.
    total = pl.pallas_call(
        functools.partial(_focal_sum_kernel, float(gamma), rows, cols,
                          tile_b, tile_c, need_mask),
        out_shape=jax.ShapeDtypeStruct((1, 1), jnp.float32),
        grid=grid,
        in_specs=in_specs,
        out_specs=pl.BlockSpec((1, 1), lambda i, j: (0, 0)),
        compiler_params=pltpu.CompilerParams(
            dimension_semantics=("arbitrary", "arbitrary"),
            vmem_limit_bytes=vmem_limit),
    )(x2, t2, a2)[0, 0]
    if reduction == "mean":
        return total / jnp.float32(B * C)
    return total


def _reference_focal_loss(inputs, targets, alpha, gamma=2.0, reduction="mean"):
    """Pure-JAX reference (independent of the kernel math tricks)."""
    x = jnp.asarray(inputs, jnp.float32)
    t = jnp.asarray(targets, jnp.float32)
    a = jnp.asarray(alpha, jnp.float32)
    a = jnp.broadcast_to(a.reshape(1, -1) if a.ndim else a, x.shape)
    bce = jnp.maximum(x, 0.0) - x * t + jnp.log1p(jnp.exp(-jnp.abs(x)))
    probs = jax.nn.sigmoid(x)
    p_t = t * probs + (1.0 - t) * (1.0 - probs)
    loss = a * (1.0 - p_t) ** gamma * bce
    if reduction == "mean":
        return loss.mean()
    if reduction == "sum":
        return loss.sum()
    return loss


if __name__ == "__main__":
    gamma = 2.0
    rtol, atol = 2e-3, 1e-5

    # --- small shape consistent with the module's forward: (batch, classes) --
    B, C = 2, 4
    key = jax.random.PRNGKey(0)
    k_logits, k_targets = jax.random.split(key)
    logits = jax.random.normal(k_logits, (B, C), dtype=jnp.float32)
    targets = (jax.random.uniform(k_targets, (B, C)) > 0.5).astype(jnp.float32)
    alpha_vector = jnp.array([0.25, 0.5, 0.75, 1.0], dtype=jnp.float32)

    out_mean = jax.block_until_ready(
        focal_loss(logits, targets, alpha_vector, gamma=gamma, reduction="mean"))
    ref_mean = _reference_focal_loss(logits, targets, alpha_vector, gamma, "mean")
    assert jnp.allclose(out_mean, ref_mean, rtol=rtol, atol=atol), (out_mean, ref_mean)

    out_sum = jax.block_until_ready(
        focal_loss(logits, targets, alpha_vector, gamma=gamma, reduction="sum"))
    ref_sum = _reference_focal_loss(logits, targets, alpha_vector, gamma, "sum")
    assert jnp.allclose(out_sum, ref_sum, rtol=rtol, atol=atol), (out_sum, ref_sum)

    out_none = jax.block_until_ready(
        focal_loss(logits, targets, alpha_vector, gamma=gamma, reduction="none"))
    ref_none = _reference_focal_loss(logits, targets, alpha_vector, gamma, "none")
    assert jnp.allclose(out_none, ref_none, rtol=rtol, atol=atol)

    # --- lane-folding path: tiny C folded into a dense 128-lane row ---------
    B2, C2 = 256, 4
    kl2, kt2 = jax.random.split(jax.random.PRNGKey(1))
    logits2 = jax.random.normal(kl2, (B2, C2), dtype=jnp.float32)
    targets2 = (jax.random.uniform(kt2, (B2, C2)) > 0.5).astype(jnp.float32)
    out2 = jax.block_until_ready(
        focal_loss(logits2, targets2, alpha_vector, gamma=gamma, reduction="mean"))
    ref2 = _reference_focal_loss(logits2, targets2, alpha_vector, gamma, "mean")
    assert jnp.allclose(out2, ref2, rtol=rtol, atol=atol), (out2, ref2)

    # --- multi-tile grid + masking path (grid-accumulated reduction) --------
    B3, C3 = 1000, 130
    kl3, kt3 = jax.random.split(jax.random.PRNGKey(2))
    logits3 = jax.random.normal(kl3, (B3, C3), dtype=jnp.float32)
    targets3 = (jax.random.uniform(kt3, (B3, C3)) > 0.5).astype(jnp.float32)
    alpha3 = jnp.linspace(0.1, 1.0, C3, dtype=jnp.float32)
    out3 = jax.block_until_ready(
        focal_loss(logits3, targets3, alpha3, gamma=gamma, reduction="mean"))
    ref3 = _reference_focal_loss(logits3, targets3, alpha3, gamma, "mean")
    assert jnp.allclose(out3, ref3, rtol=rtol, atol=atol), (out3, ref3)

    print("KERNEL_OK")
</pallas_src>

<mosaic_0001>
module attributes {stable_mosaic.version = 11 : i64} {
  func.func @_focal_sum_kernel(%arg0: i32, %arg1: i32, %arg2: memref<8x128xf32, #tpu.memory_space<vmem>>, %arg3: memref<8x128xf32, #tpu.memory_space<vmem>>, %arg4: memref<1x128xf32, #tpu.memory_space<vmem>>, %arg5: memref<1x1xf32, #tpu.memory_space<vmem>>) attributes {dimension_semantics = [#tpu.dimension_semantics<arbitrary>, #tpu.dimension_semantics<arbitrary>], iteration_bounds = array<i64: 1, 1>, scalar_prefetch = 0 : i64, scratch_operands = 0 : i64, tpu.core_type = #tpu.core_type<tc>, window_params = [{transform_indices = @transform_0, window_bounds = array<i64: 8, 128>}, {transform_indices = @transform_1, window_bounds = array<i64: 8, 128>}, {transform_indices = @transform_2, window_bounds = array<i64: 1, 128>}, {pipeline_mode = #tpu.pipeline_mode<synchronous>, transform_indices = @transform_3, window_bounds = array<i64: 1, 1>}]} {
    %c0_i32 = arith.constant 0 : i32
    %0 = arith.cmpi eq, %arg0, %c0_i32 : i32
    %c0_i32_0 = arith.constant 0 : i32
    %1 = arith.cmpi eq, %arg1, %c0_i32_0 : i32
    %2 = arith.andi %0, %1 : i1
    %3 = arith.extui %2 : i1 to i32
    %c0_i32_1 = arith.constant 0 : i32
    %4 = arith.cmpi ne, %3, %c0_i32_1 : i32
    scf.if %4 {
      %cst_22 = arith.constant 0.000000e+00 : f32
      %66 = vector.broadcast %cst_22 : f32 to vector<1x1xf32>
      %c0_23 = arith.constant 0 : index
      %c0_24 = arith.constant 0 : index
      %67 = vector.load %arg5[%c0_23, %c0_24] : memref<1x1xf32, #tpu.memory_space<vmem>>, vector<1x1xf32>
      tpu.vector_store %arg5[%c0_23, %c0_24], %66 {strides = array<i32>} : memref<1x1xf32, #tpu.memory_space<vmem>>, vector<1x1xf32>,
    } else {
    }
    %c0 = arith.constant 0 : index
    %c0_2 = arith.constant 0 : index
    %5 = vector.load %arg2[%c0, %c0_2] : memref<8x128xf32, #tpu.memory_space<vmem>>, vector<8x128xf32>
    %c0_3 = arith.constant 0 : index
    %c0_4 = arith.constant 0 : index
    %6 = vector.load %arg3[%c0_3, %c0_4] : memref<8x128xf32, #tpu.memory_space<vmem>>, vector<8x128xf32>
    %c0_5 = arith.constant 0 : index
    %c0_6 = arith.constant 0 : index
    %7 = vector.load %arg4[%c0_5, %c0_6] : memref<1x128xf32, #tpu.memory_space<vmem>>, vector<1x128xf32>
    %8 = math.absf %5 : vector<8x128xf32>
    %cst = arith.constant 0.000000e+00 : f32
    %9 = vector.broadcast %cst : f32 to vector<8x128xf32>
    %10 = arith.subf %9, %8 : vector<8x128xf32>
    %11 = math.exp %10 : vector<8x128xf32>
    %cst_7 = arith.constant 0.000000e+00 : f32
    %12 = vector.broadcast %cst_7 : f32 to vector<8x128xf32>
    %13 = arith.maximumf %5, %12 : vector<8x128xf32>
    %14 = arith.mulf %5, %6 : vector<8x128xf32>
    %15 = arith.subf %13, %14 : vector<8x128xf32>
    %cst_8 = arith.constant 1.000000e+00 : f32
    %16 = vector.broadcast %cst_8 : f32 to vector<8x128xf32>
    %17 = arith.addf %16, %11 : vector<8x128xf32>
    %18 = math.log %17 : vector<8x128xf32>
    %19 = arith.addf %15, %18 : vector<8x128xf32>
    %cst_9 = arith.constant 1.000000e+00 : f32
    %20 = vector.broadcast %cst_9 : f32 to vector<8x128xf32>
    %21 = arith.addf %20, %11 : vector<8x128xf32>
    %cst_10 = arith.constant 1.000000e+00 : f32
    %22 = vector.broadcast %cst_10 : f32 to vector<8x128xf32>
    %23 = arith.divf %22, %21 : vector<8x128xf32>
    %cst_11 = arith.constant 0.000000e+00 : f32
    %24 = vector.broadcast %cst_11 : f32 to vector<8x128xf32>
    %25 = arith.cmpf oge, %5, %24 : vector<8x128xf32>
    %26 = arith.mulf %11, %23 : vector<8x128xf32>
    %27 = arith.select %25, %23, %26 : vector<8x128xi1>, vector<8x128xf32>
    %28 = arith.mulf %6, %27 : vector<8x128xf32>
    %cst_12 = arith.constant 1.000000e+00 : f32
    %29 = vector.broadcast %cst_12 : f32 to vector<8x128xf32>
    %30 = arith.subf %29, %6 : vector<8x128xf32>
    %cst_13 = arith.constant 1.000000e+00 : f32
    %31 = vector.broadcast %cst_13 : f32 to vector<8x128xf32>
    %32 = arith.subf %31, %27 : vector<8x128xf32>
    %33 = arith.mulf %30, %32 : vector<8x128xf32>
    %34 = arith.addf %28, %33 : vector<8x128xf32>
    %cst_14 = arith.constant 1.000000e+00 : f32
    %35 = vector.broadcast %cst_14 : f32 to vector<8x128xf32>
    %36 = arith.subf %35, %34 : vector<8x128xf32>
    %cst_15 = arith.constant 0.000000e+00 : f32
    %37 = vector.broadcast %cst_15 : f32 to vector<8x128xf32>
    %38 = arith.maximumf %36, %37 : vector<8x128xf32>
    %39 = arith.mulf %38, %38 : vector<8x128xf32>
    %40 = vector.broadcast %7 : vector<1x128xf32> to vector<8x128xf32>
    %41 = arith.mulf %40, %39 : vector<8x128xf32>
    %42 = arith.mulf %41, %19 : vector<8x128xf32>
    %c8_i32 = arith.constant 8 : i32
    %43 = arith.muli %arg0, %c8_i32 : i32
    %44 = tpu.iota {dimensions = array<i32: 0>} : vector<8x128xi32>
    %45 = vector.broadcast %43 : i32 to vector<8x128xi32>
    %46 = arith.addi %45, %44 : vector<8x128xi32>
    %c128_i32 = arith.constant 128 : i32
    %47 = arith.muli %arg1, %c128_i32 : i32
    %48 = tpu.iota {dimensions = array<i32: 1>} : vector<8x128xi32>
    %49 = vector.broadcast %47 : i32 to vector<8x128xi32>
    %50 = arith.addi %49, %48 : vector<8x128xi32>
    %c2_i32 = arith.constant 2 : i32
    %51 = vector.broadcast %c2_i32 : i32 to vector<8x128xi32>
    %52 = arith.cmpi slt, %46, %51 : vector<8x128xi32>
    %c4_i32 = arith.constant 4 : i32
    %53 = vector.broadcast %c4_i32 : i32 to vector<8x128xi32>
    %54 = arith.cmpi slt, %50, %53 : vector<8x128xi32>
    %55 = arith.andi %52, %54 : vector<8x128xi1>
    %cst_16 = arith.constant 0.000000e+00 : f32
    %56 = vector.broadcast %cst_16 : f32 to vector<8x128xf32>
    %57 = arith.select %55, %42, %56 : vector<8x128xi1>, vector<8x128xf32>
    %c0_17 = arith.constant 0 : index
    %c0_18 = arith.constant 0 : index
    %58 = vector.load %arg5[%c0_17, %c0_18] : memref<1x1xf32, #tpu.memory_space<vmem>>, vector<1x1xf32>
    %59 = vector.shape_cast %57 : vector<8x128xf32> to vector<1x8x128xf32>
    %cst_19 = arith.constant dense<0.000000e+00> : vector<1xf32>
    %60 = vector.multi_reduction <add>, %59, %cst_19 [1, 2] : vector<1x8x128xf32> to vector<1xf32>
    %61 = vector.shape_cast %60 : vector<1xf32> to vector<1x1x1xf32>
    %62 = vector.extract %61[0, 0, 0] : f32 from vector<1x1x1xf32>
    %63 = vector.broadcast %62 : f32 to vector<1x1xf32>
    %64 = arith.addf %58, %63 : vector<1x1xf32>
    %c0_20 = arith.constant 0 : index
    %c0_21 = arith.constant 0 : index
    %65 = vector.load %arg5[%c0_20, %c0_21] : memref<1x1xf32, #tpu.memory_space<vmem>>, vector<1x1xf32>
    tpu.vector_store %arg5[%c0_20, %c0_21], %64 {strides = array<i32>} : memref<1x1xf32, #tpu.memory_space<vmem>>, vector<1x1xf32>,
    return
  }
  func.func @transform_0(%arg0: i32, %arg1: i32) -> (i32, i32) {
    %c0_i32 = arith.constant 0 : i32
    return %arg0, %arg1 : i32, i32
  }
  func.func @transform_1(%arg0: i32, %arg1: i32) -> (i32, i32) {
    %c0_i32 = arith.constant 0 : i32
    return %arg0, %arg1 : i32, i32
  }
  func.func @transform_2(%arg0: i32, %arg1: i32) -> (i32, i32) {
    %c0_i32 = arith.constant 0 : i32
    %c0_i32_0 = arith.constant 0 : i32
    return %c0_i32, %arg1 : i32, i32
  }
  func.func @transform_3(%arg0: i32, %arg1: i32) -> (i32, i32) {
    %c0_i32 = arith.constant 0 : i32
    %c0_i32_0 = arith.constant 0 : i32
    %c0_i32_1 = arith.constant 0 : i32
    return %c0_i32, %c0_i32_0 : i32, i32
  }
}

</mosaic_0001>

<bundles_post_ra>
// kernel: tpu_custom_call.1
= control target key start
LH: loop header
LB: loop body
LE: loop exit
PB: predicated region body
PF: predicated region fallthrough
CT: control target
= control target key end

     0   :  { %8 = vsyncpa [#allocation3], 0  ;;  %s243_s0 = inlined_call_operand.hbm [shape: f32[8,128], index: 0, kind: input, shape index: {}]   ;;  %s244_s1 = inlined_call_operand.hbm [shape: f32[8,128], index: 1, kind: input, shape index: {}]   ;;  %s245_s2 = inlined_call_operand.vmem [shape: f32[1,128], index: 2, kind: input, shape index: {}]   ;;  %s246_s3 = inlined_call_operand.hbm [shape: f32[1,1], index: 3, kind: output, shape index: {}]  }
   0x1   :  { %9 = vsyncpa [#allocation6], 0 }
   0x2   :  { %10 = vsyncpa [#allocation4], 0  ;;  %s205_s12 = smov [#allocation2]   ;;  %s206_s14 = smov [#allocation5]  }
   0x3   :  { %s17_s13 = sshll.u32 %s205_s12, 4  ;;  %s27_s15 = sshll.u32 %s206_s14, 4  ;;  %s18_s13 = int_to_ptr.vmem [resolvable:$true] %s17_s13  ;;  %s28_s15 = int_to_ptr.vmem [resolvable:$true] %s27_s15 }
   0x4   :  { %s147_s16 = scalar_lea.vmem %s18_s13, 128  ;;  %p152_p1 = scmp.lt.s32.totalorder %s18_s13, %s18_s13 }
   0x5   :  { %p148_p0 = scmp.ne.s32.totalorder %s18_s13, %s147_s16  ;;  %p153_p2 = scmp.lt.s32.totalorder %s147_s16, %s147_s16 }
   0x7   :  { %p154_p3 = por %p153_p2, %p152_p1 }
   0x9   :  { %p155_p4 = pnand %p154_p3, %p148_p0 }
   0xb   :  { %158 = shalt.err (!%p155_p4)
}
   0xc   :  { %20 = dma.hbm_to_vmem [thread:$0]  %s243_s0, 128, %s18_s13, [#allocation3]  }
   0xd   :  { %s167_s19 = scalar_lea.vmem %s28_s15, 128  ;;  %p172_p6 = scmp.lt.s32.totalorder %s28_s15, %s28_s15 }
   0xe   :  { %p168_p5 = scmp.ne.s32.totalorder %s28_s15, %s167_s19  ;;  %p173_p7 = scmp.lt.s32.totalorder %s167_s19, %s167_s19 }
  0x10   :  { %p174_p8 = por %p173_p7, %p172_p6 }
  0x12   :  { %p175_p9 = pnand %p174_p8, %p168_p5 }
  0x14   :  { %178 = shalt.err (!%p175_p9)
}
  0x15   :  { %30 = dma.hbm_to_vmem [thread:$0]  %s244_s1, 128, %s28_s15, [#allocation6]  }
  0x16   :  { %199 = dma.done.wait [#allocation3], 128  }
  0x17   :  { %200 = vsyncadd [#allocation3], 4294967168 }
  0x18   :  { %201 = dma.done.wait [#allocation6], 128  }
  0x19   :  { %202 = vsyncadd [#allocation6], 4294967168  ;;  %vm45_vm0 = vcmask 0   ;;  %v207_v0 = vmov 0.0   ;;  %v47_v1 = vld [vmem:[#allocation2] sm:$0xff]  ;;  %v48_v7 = vld [vmem:[#allocation5] sm:$0xff]  ;;  %v83_v14 = vlaneseq }
  0x1a   :  { %46 = vst.msk [vmem:[#allocation7] sm:$0x1] %vm45_vm0, %v207_v0  ;;  %v50_v2 = vand.u32 2147483647, %v47_v1  ;;  %vm63_vm1 = vcmp.ge.f32.partialorder %v47_v1, 0.0  ;;  %v67_v10 = vsub.f32 1.0, %v48_v7  ;;  %v55_v16 = vmul.f32 %v48_v7, %v47_v1 }
  0x1b   :  { %v54_v15 = vmax.f32 %v47_v1, 0.0  ;;  %v84_v20 = vshrl.u32 %v83_v14, 7  ;;  %v89_v24 = vand.u32 127, %v83_v14  ;;  %v126_v26 = vld [vmem:[%s245_s2] ss:$0 sm:$0xff]  ;;  %s208_s22 = smov [#allocation7]  }
  0x1c   :  { %v51_v3 = vsub.f32 0.0, %v50_v2  ;;  %s116_s2 = sshll.u32 %s208_s22, 4  ;;  %s117_s2 = int_to_ptr.vmem [resolvable:$true] %s116_s2 }
  0x1d   :  { %v56_v21 = vsub.f32 %v54_v15, %v55_v16  ;;  %vm92_vm2 = vcmp.lt.s32.totalorder %v84_v20, 2  ;;  %vm93_vm3 = vcmp.lt.s32.totalorder %v89_v24, 4  ;;  %s179_s24 = scalar_lea.vmem %s117_s2, 16  ;;  %s183_s25 = scalar_lea.vmem %s117_s2, 32 }
  0x1e   :  { %v52_v4 = vmul.f32 1.442695, %v51_v3  ;;  %vm94_vm4 = vmand %vm92_vm2, %vm93_vm3  ;;  %p180_p10 = scmp.ne.s32.totalorder %s117_s2, %s179_s24  ;;  %p184_p11 = scmp.lt.s32.totalorder %s117_s2, %s117_s2 }
  0x1f   :  { %p185_p12 = scmp.lt.s32.totalorder %s183_s25, %s179_s24 }
  0x20   :  { %133 = vpow2.f32 %v52_v4 }
  0x21   :  { %v96_v39 = vld [vmem:[#allocation7] sm:$0x1]  ;;  %p186_p13 = por %p185_p12, %p184_p11 }
  0x23   :  { %p187_p0 = pnand %p186_p13, %p180_p10 }
  0x2d   :  { %v134_v5 = vpop.eup %133 }
  0x2e   :  { %v57_v6 = vadd.f32 1.0, %v134_v5 }
  0x30   :  { %135 = vrcp.f32 %v57_v6 }
  0x31   :  { %137 = vlog2.f32 %v57_v6 }
  0x3d   :  { %v136_v8 = vpop.eup %135 }
  0x3e   :  { %v64_v9 = vmul.f32 %v136_v8, %v134_v5  ;;  %v138_v18 = vpop.eup %137 }
  0x3f   :  { %v59_v22 = vmul.f32 0.6931472, %v138_v18 }
  0x40   :  { %v65_v11 = vsel %vm63_vm1, %v136_v8, %v64_v9 }
  0x41   :  { %v66_v12 = vmul.f32 %v65_v11, %v48_v7  ;;  %v68_v13 = vsub.f32 1.0, %v65_v11  ;;  %v60_v27 = vadd.f32 %v59_v22, %v56_v21 }
  0x43   :  { %v69_v17 = vmul.f32 %v68_v13, %v67_v10 }
  0x45   :  { %v70_v19 = vadd.f32 %v69_v17, %v66_v12 }
  0x47   :  { %v71_v23 = vsub.f32 1.0, %v70_v19 }
  0x49   :  { %v72_v25 = vmax.f32 %v71_v23, 0.0 }
  0x4b   :  { %v73_v28 = vmul.f32 %v72_v25, %v72_v25 }
  0x4d   :  { %v80_v29 = vmul.f32 %v126_v26, %v73_v28 }
  0x4f   :  { %v81_v30 = vmul.f32 %v80_v29, %v60_v27 }
  0x51   :  { %v95_v31 = vsel %vm94_vm4, %v81_v30, 0.0 }
  0x52   :  { %97 = vadd.xlane.f32.xlu0 %v95_v31 }
  0xdb   :  { %v98_v32 = vpop.xlane.xlu0 %97 }
  0xdc   :  { %v99_v33 = vrot.slane %v98_v32, 4 }
  0xde   :  { %v100_v34 = vadd.f32 %v99_v33, %v98_v32 }
  0xe0   :  { %v101_v35 = vrot.slane %v100_v34, 2 }
  0xe2   :  { %v102_v36 = vadd.f32 %v101_v35, %v100_v34 }
  0xe4   :  { %v103_v37 = vrot.slane %v102_v36, 1 }
  0xe6   :  { %v104_v38 = vadd.f32 %v103_v37, %v102_v36 }
  0xe8   :  { %127 = vpush %v104_v38 }
 0x119   :  { %s128_s23 = spop %127 }
 0x11a   :  { %v106_v40 = vstv %s128_s23 }
 0x11b   :  { %v107_v41 = vadd.f32 %v106_v40, %v96_v39 }
 0x11d   :  { %109 = vst.msk [vmem:[#allocation7] sm:$0x1] %vm45_vm0, %v107_v41 }
 0x11e   :  { %190 = shalt.err (!%p187_p0)
}
 0x11f   :  { %119 = dma.vmem_to_hbm [thread:$0]  %s117_s2, 16, %s246_s3, [#allocation4]  }
 0x120   :  { %203 = dma.done.wait [#allocation4], 16  }
 0x121   :  { %204 = vsyncadd [#allocation4], 4294967280 }
 0x122   :  { %123 = vsyncpa [#allocation3], 1 }
 0x123   :  { %124 = vsyncpa [#allocation6], 1 }
 0x124   :  { %125 = vsyncpa [#allocation4], 1 }

</bundles_post_ra>
